<compile_context>
chip_gen: v5e
topology: v5e:2x2
jax: 0.10.0
libtpu: 0.0.40
codegen_flags: <defaults>
</compile_context>

<pallas_src>
import functools

import jax
import jax.numpy as jnp
from jax import lax
from jax.experimental import pallas as pl
from jax.experimental.pallas import tpu as pltpu

N_ROWS = 16        # 10 hidden rows + 1 single-linear row + 5 zero rows (multiple of 8 sublanes)
IN_FEATURES = 20


def _round_up(n, m):
    return ((n + m - 1) // m) * m


def ensemble_kernel(x_ref, wcat_ref, b2a_ref, wout_ref, bias_ref, o_ref):
    x = x_ref[...]                                            # (tb, 20) natural layout
    # Fused first stage on the MXU: rows 0..9 = Multi_Linear hidden pre-activations,
    # row 10 = Single_Linear output (already scaled by folded concat weight), rows 11..15 = 0.
    z = lax.dot_general(
        wcat_ref[...], x,
        dimension_numbers=(((1,), (1,)), ((), ())),           # contract the 20-feature axis
        preferred_element_type=jnp.float32)                   # (16, tb), batch lane-dense
    row = lax.broadcasted_iota(jnp.int32, (N_ROWS, 1), 0)
    # tanh only applies to the 10 hidden rows; other rows pass through (and carry weight 0 or 1).
    act = jnp.where(row < 10, jnp.tanh(z + b2a_ref[...]), z)  # (16, tb)
    y = jnp.sum(act * wout_ref[...], axis=0, keepdims=True)   # (1, tb) sublane reduce (XLU/VPU)
    o_ref[...] = (y + bias_ref[...]).astype(o_ref.dtype)


def _prepare_params(params):
    """Fold concat_linear into the branch weights and pad the fused weight to 16 rows."""
    (w1, b1, w2a, b2a, w2b, b2b, wc, bc) = params
    wcat = jnp.zeros((N_ROWS, IN_FEATURES), jnp.float32)
    wcat = wcat.at[0:10, :].set(w2a.T.astype(jnp.float32))                 # hidden 20->10
    wcat = wcat.at[10, :].set((w1[:, 0] * wc[0]).astype(jnp.float32))      # single linear * wc0
    b2a_ext = jnp.zeros((N_ROWS, 1), jnp.float32).at[0:10, 0].set(b2a.reshape(10))
    wout = (jnp.zeros((N_ROWS, 1), jnp.float32)
            .at[0:10, 0].set((w2b[:, 0] * wc[1]).astype(jnp.float32))      # 10->1 * wc1
            .at[10, 0].set(1.0))                                           # pass-through row
    bias = (b1.reshape(()) * wc[0] + b2b.reshape(()) * wc[1] + bc.reshape(()))
    return wcat, b2a_ext, wout, bias.reshape(1, 1).astype(jnp.float32)


@functools.partial(jax.jit, static_argnames=("tile_b",))
def ensemble_forward(x, params, *, tile_b=16384):
    """x: (B, 20) float; same semantics as Ensemble_model.forward([x]); returns (B, 1)."""
    wcat, b2a_ext, wout, bias = _prepare_params(params)
    x = x.astype(jnp.float32)
    B = x.shape[0]

    B_pad = _round_up(B, 128)          # lane padding for the output allocation only (no x copy)
    # Tile: multiple of 128, capped by tile_b and the padded batch, sized so larger batches get
    # >=4 grid steps (lets v7x shard the "parallel" batch axis across its two TensorCores).
    tb = min(tile_b, B_pad, max(128, _round_up(pl.cdiv(B_pad, 4), 128)))
    grid = (pl.cdiv(B_pad, tb),)

    # Only copy x when one tile is larger than the whole batch (tiny-B case).  Otherwise the
    # final partial block uses Pallas' masked edge reads -- no extra host-side pass over x.
    if tb > B:
        x = jnp.pad(x, ((0, tb - B), (0, 0)))

    n_cols = grid[0] * tb
    cost = pl.CostEstimate(
        flops=2 * n_cols * IN_FEATURES * N_ROWS + 6 * n_cols * N_ROWS,
        transcendentals=N_ROWS * n_cols,
        bytes_accessed=B * IN_FEATURES * 4 + B_pad * 4 + (N_ROWS * (IN_FEATURES + 2) + 1) * 4,
    )

    out = pl.pallas_call(
        ensemble_kernel,
        out_shape=jax.ShapeDtypeStruct((1, B_pad), jnp.float32),
        grid=grid,
        in_specs=[
            pl.BlockSpec((tb, IN_FEATURES), lambda i: (i, 0)),      # x tile, natural layout
            pl.BlockSpec((N_ROWS, IN_FEATURES), lambda i: (0, 0)),  # fused/padded stage-1 weight
            pl.BlockSpec((N_ROWS, 1), lambda i: (0, 0)),            # padded hidden bias column
            pl.BlockSpec((N_ROWS, 1), lambda i: (0, 0)),            # folded stage-2 weight column
            pl.BlockSpec((1, 1), lambda i: (0, 0)),                 # folded output bias
        ],
        out_specs=pl.BlockSpec((1, tb), lambda i: (0, i)),          # lane-dense output
        compiler_params=pltpu.CompilerParams(
            dimension_semantics=("parallel",),
            # Double-buffered (tb,20) f32 input pads to 128 lanes in VMEM (~16 MiB at tb=16K)
            # plus a few MiB of elementwise temporaries; 48 MiB stays under v7x's 64 MiB/TC.
            vmem_limit_bytes=48 * 1024 * 1024,
        ),
        cost_estimate=cost,
    )(x, wcat, b2a_ext, wout, bias)

    return out[:, :B].T                                             # (B, 1)


def init_params(key):
    # Deterministic synthetic init; shapes match the PyTorch module, weights stored as (in, out).
    ks = jax.random.split(key, 8)
    w1 = jax.random.normal(ks[0], (20, 1), jnp.float32) * 0.1    # Single_Linear.linear
    b1 = jax.random.normal(ks[1], (1, 1), jnp.float32) * 0.1
    w2a = jax.random.normal(ks[2], (20, 10), jnp.float32) * 0.1  # Multi_Linear.linear
    b2a = jax.random.normal(ks[3], (1, 10), jnp.float32) * 0.1
    w2b = jax.random.normal(ks[4], (10, 1), jnp.float32) * 0.1   # Multi_Linear.linear_2
    b2b = jax.random.normal(ks[5], (1, 1), jnp.float32) * 0.1
    wc = jax.random.normal(ks[6], (2,), jnp.float32) * 0.1       # concat_linear weight
    bc = jax.random.normal(ks[7], (1,), jnp.float32) * 0.1       # concat_linear bias
    return (w1, b1, w2a, b2a, w2b, b2b, wc, bc)


def reference_forward(x, params):
    (w1, b1, w2a, b2a, w2b, b2b, wc, bc) = params
    y1 = x @ w1 + b1
    y2 = jnp.tanh(x @ w2a + b2a) @ w2b + b2b
    concat = jnp.concatenate([y1, y2], axis=-1)
    return concat @ wc.reshape(2, 1) + bc


if __name__ == "__main__":
    key = jax.random.PRNGKey(0)
    k_x, k_x2, k_p = jax.random.split(key, 3)
    params = init_params(k_p)

    # Small case matching the module spec (in_features = 20).
    B = 8
    x = jax.random.normal(k_x, (B, 20), jnp.float32)
    out = jax.block_until_ready(ensemble_forward(x, params))
    ref = reference_forward(x, params)
    assert out.shape == (B, 1)
    assert jnp.allclose(out, ref, atol=1e-4, rtol=1e-4)

    # Larger, non-tile-divisible batch to exercise the multi-step grid + partial-block path.
    B2 = 1000
    x2 = jax.random.normal(k_x2, (B2, 20), jnp.float32)
    out2 = jax.block_until_ready(ensemble_forward(x2, params))
    ref2 = reference_forward(x2, params)
    assert out2.shape == (B2, 1)
    assert jnp.allclose(out2, ref2, atol=1e-4, rtol=1e-4)

    print("KERNEL_OK")
</pallas_src>

<mosaic_0001>
module attributes {stable_mosaic.version = 11 : i64} {
  func.func @ensemble_kernel(%arg0: i32, %arg1: memref<128x20xf32, #tpu.memory_space<vmem>>, %arg2: memref<16x20xf32, #tpu.memory_space<vmem>>, %arg3: memref<16x1xf32, #tpu.memory_space<vmem>>, %arg4: memref<16x1xf32, #tpu.memory_space<vmem>>, %arg5: memref<1x1xf32, #tpu.memory_space<vmem>>, %arg6: memref<1x128xf32, #tpu.memory_space<vmem>>) attributes {dimension_semantics = [#tpu.dimension_semantics<parallel>], iteration_bounds = array<i64: 1>, scalar_prefetch = 0 : i64, scratch_operands = 0 : i64, tpu.core_type = #tpu.core_type<tc>, window_params = [{transform_indices = @transform_0, window_bounds = array<i64: 128, 20>}, {pipeline_mode = #tpu.pipeline_mode<synchronous>, transform_indices = @transform_1, window_bounds = array<i64: 16, 20>}, {pipeline_mode = #tpu.pipeline_mode<synchronous>, transform_indices = @transform_2, window_bounds = array<i64: 16, 1>}, {pipeline_mode = #tpu.pipeline_mode<synchronous>, transform_indices = @transform_3, window_bounds = array<i64: 16, 1>}, {pipeline_mode = #tpu.pipeline_mode<synchronous>, transform_indices = @transform_4, window_bounds = array<i64: 1, 1>}, {transform_indices = @transform_5, window_bounds = array<i64: 1, 128>}]} {
    %c0 = arith.constant 0 : index
    %c0_0 = arith.constant 0 : index
    %0 = vector.load %arg1[%c0, %c0_0] : memref<128x20xf32, #tpu.memory_space<vmem>>, vector<128x20xf32>
    %c0_1 = arith.constant 0 : index
    %c0_2 = arith.constant 0 : index
    %1 = vector.load %arg2[%c0_1, %c0_2] : memref<16x20xf32, #tpu.memory_space<vmem>>, vector<16x20xf32>
    %cst = arith.constant dense<0.000000e+00> : vector<16x128xf32>
    %2 = tpu.matmul %1, %0, %cst {dimension_numbers = #tpu.dot_dimension_numbers<[1], [1], [0], [0], [0, 0, 1, 0], [], []>} : vector<16x20xf32>, vector<128x20xf32>, vector<16x128xf32> -> vector<16x128xf32>
    %3 = tpu.iota {dimensions = array<i32: 0>} : vector<16x1xi32>
    %c10_i32 = arith.constant 10 : i32
    %4 = vector.broadcast %c10_i32 : i32 to vector<16x1xi32>
    %5 = arith.cmpi slt, %3, %4 : vector<16x1xi32>
    %c0_3 = arith.constant 0 : index
    %c0_4 = arith.constant 0 : index
    %6 = vector.load %arg3[%c0_3, %c0_4] : memref<16x1xf32, #tpu.memory_space<vmem>>, vector<16x1xf32>
    %7 = vector.broadcast %6 : vector<16x1xf32> to vector<16x128xf32>
    %8 = arith.addf %2, %7 : vector<16x128xf32>
    %9 = math.tanh %8 : vector<16x128xf32>
    %10 = vector.shape_cast %5 : vector<16x1xi1> to vector<16x1xi1>
    %11 = vector.broadcast %10 : vector<16x1xi1> to vector<16x128xi1>
    %12 = arith.select %11, %9, %2 : vector<16x128xi1>, vector<16x128xf32>
    %c0_5 = arith.constant 0 : index
    %c0_6 = arith.constant 0 : index
    %13 = vector.load %arg4[%c0_5, %c0_6] : memref<16x1xf32, #tpu.memory_space<vmem>>, vector<16x1xf32>
    %14 = vector.broadcast %13 : vector<16x1xf32> to vector<16x128xf32>
    %15 = arith.mulf %12, %14 : vector<16x128xf32>
    %cst_7 = arith.constant dense<0.000000e+00> : vector<128xf32>
    %16 = vector.multi_reduction <add>, %15, %cst_7 [0] : vector<16x128xf32> to vector<128xf32>
    %17 = vector.shape_cast %16 : vector<128xf32> to vector<1x128xf32>
    %c0_8 = arith.constant 0 : index
    %c0_9 = arith.constant 0 : index
    %18 = vector.load %arg5[%c0_8, %c0_9] : memref<1x1xf32, #tpu.memory_space<vmem>>, vector<1x1xf32>
    %19 = vector.broadcast %18 : vector<1x1xf32> to vector<1x128xf32>
    %20 = arith.addf %17, %19 : vector<1x128xf32>
    %c0_10 = arith.constant 0 : index
    %c0_11 = arith.constant 0 : index
    %21 = vector.load %arg6[%c0_10, %c0_11] : memref<1x128xf32, #tpu.memory_space<vmem>>, vector<1x128xf32>
    tpu.vector_store %arg6[%c0_10, %c0_11], %20 {strides = array<i32>} : memref<1x128xf32, #tpu.memory_space<vmem>>, vector<1x128xf32>,
    return
  }
  func.func @transform_0(%arg0: i32) -> (i32, i32) {
    %c0_i32 = arith.constant 0 : i32
    %c0_i32_0 = arith.constant 0 : i32
    return %arg0, %c0_i32 : i32, i32
  }
  func.func @transform_1(%arg0: i32) -> (i32, i32) {
    %c0_i32 = arith.constant 0 : i32
    %c0_i32_0 = arith.constant 0 : i32
    %c0_i32_1 = arith.constant 0 : i32
    return %c0_i32, %c0_i32_0 : i32, i32
  }
  func.func @transform_2(%arg0: i32) -> (i32, i32) {
    %c0_i32 = arith.constant 0 : i32
    %c0_i32_0 = arith.constant 0 : i32
    %c0_i32_1 = arith.constant 0 : i32
    return %c0_i32, %c0_i32_0 : i32, i32
  }
  func.func @transform_3(%arg0: i32) -> (i32, i32) {
    %c0_i32 = arith.constant 0 : i32
    %c0_i32_0 = arith.constant 0 : i32
    %c0_i32_1 = arith.constant 0 : i32
    return %c0_i32, %c0_i32_0 : i32, i32
  }
  func.func @transform_4(%arg0: i32) -> (i32, i32) {
    %c0_i32 = arith.constant 0 : i32
    %c0_i32_0 = arith.constant 0 : i32
    %c0_i32_1 = arith.constant 0 : i32
    return %c0_i32, %c0_i32_0 : i32, i32
  }
  func.func @transform_5(%arg0: i32) -> (i32, i32) {
    %c0_i32 = arith.constant 0 : i32
    %c0_i32_0 = arith.constant 0 : i32
    return %c0_i32, %arg0 : i32, i32
  }
}

</mosaic_0001>

<bundles_post_ra>
// kernel: ensemble_forward.1
= control target key start
LH: loop header
LB: loop body
LE: loop exit
PB: predicated region body
PF: predicated region fallthrough
CT: control target
= control target key end

     0   :  { %vm40_vm0 = vcmask 162816   ;;  %v221_v9 = vmov 0   ;;  %v118_v26 = vlaneseq  ;;  %s358_s0 = inlined_call_operand.vmem [shape: f32[128,20], index: 0, kind: input, shape index: {}]   ;;  %s359_s2 = inlined_call_operand.vmem [shape: f32[16,1], index: 2, kind: input, shape index: {}]   ;;  %s360_s3 = inlined_call_operand.vmem [shape: f32[16,1], index: 3, kind: input, shape index: {}]   ;;  %s361_s4 = inlined_call_operand.<no memory space> [shape: f32[1,1], index: 4, kind: input, shape index: {}]   ;;  %s362_s1 = inlined_call_operand.vmem [shape: f32[16,20], index: 1, kind: input, shape index: {}]   ;;  %s363_s5 = inlined_call_operand.vmem [shape: f32[1,128], index: 5, kind: output, shape index: {}]  }
   0x1   :  { %v37_v0 = vld [vmem:[%s358_s0 + $0x78] sm:$0xff]  ;;  %v36_v1 = vld [vmem:[%s358_s0 + $0x70] sm:$0xff]  ;;  %v35_v2 = vld [vmem:[%s358_s0 + $0x68] sm:$0xff]  ;;  %214 = vset.pattern.permute.xlu0 %v221_v9  ;;  %215 = vset.pattern.permute.xlu1 %v221_v9  ;;  %v10_v13 = vstv %s361_s4 }
   0x2   :  { %179 = vmatpush.xpose.msk.msra.mxu0 %vm40_vm0, %v37_v0  ;;  %197 = vmatpush.xpose.msk.msra.mxu1 %vm40_vm0, %v37_v0  ;;  %v34_v3 = vld [vmem:[%s358_s0 + $0x60] sm:$0xff]  ;;  %v33_v4 = vld [vmem:[%s358_s0 + $0x58] sm:$0xff]  ;;  %v32_v5 = vld [vmem:[%s358_s0 + $0x50] sm:$0xff]  ;;  %11 = vst [vmem:[#allocation2] sm:$0x1] %v10_v13  ;;  %v119_v30 = vshrl.u32 %v118_v26, 7 }
   0x3   :  { %v31_v6 = vld [vmem:[%s358_s0 + $0x48] sm:$0xff]  ;;  %v30_v8 = vld [vmem:[%s358_s0 + $0x40] sm:$0xff]  ;;  %216 = vset.pattern.permute.xlu2 %v221_v9  ;;  %v29_v10 = vld [vmem:[%s358_s0 + $0x38] sm:$0xff] }
   0x4   :  { %v124_v7 = vld [vmem:[%s359_s2 + $0x8] sm:$0xff]  ;;  %v123_v11 = vld [vmem:[%s359_s2] sm:$0xff]  ;;  %v28_v14 = vld [vmem:[%s358_s0 + $0x30] sm:$0xff]  ;;  %v120_v34 = vadd.s32 8, %v119_v30 }
   0x5   :  { %132 = vperm.xlu0 %214, %v124_v7   ;;  %v145_v12 = vld [vmem:[%s360_s3] sm:$0xff]  ;;  %v27_v15 = vld [vmem:[%s358_s0 + $0x28] sm:$0xff]  ;;  %v25_v19 = vld [vmem:[%s358_s0 + $0x18] sm:$0xff] }
   0x6   :  { %180 = vmatpush.xpose.msk.msra.mxu0 %vm40_vm0, %v36_v1  ;;  %198 = vmatpush.xpose.msk.msra.mxu1 %vm40_vm0, %v36_v1  ;;  %v146_v16 = vld [vmem:[%s360_s3 + $0x8] sm:$0xff]  ;;  %v26_v18 = vld [vmem:[%s358_s0 + $0x20] sm:$0xff]  ;;  %v24_v20 = vld [vmem:[%s358_s0 + $0x10] sm:$0xff]  ;;  %vm122_vm1 = vcmp.lt.s32.totalorder %v120_v34, 10 }
   0x7   :  { %149 = vperm.xlu1 %215, %v145_v12   ;;  %v23_v21 = vld [vmem:[%s358_s0 + $0x8] sm:$0xff]  ;;  %v22_v22 = vld [vmem:[%s358_s0] sm:$0xff] }
   0x8   :  { %v38_v23 = vld [vmem:[%s362_s1] sm:$0xff]  ;;  %v39_v24 = vld [vmem:[%s362_s1 + $0x8] sm:$0xff] }
   0x9   :  { %v166_v17 = vld [vmem:[#allocation2] sm:$0x1] }
   0xa   :  { %181 = vmatpush.xpose.msk.msra.mxu0 %vm40_vm0, %v35_v2  ;;  %199 = vmatpush.xpose.msk.msra.mxu1 %vm40_vm0, %v35_v2 }
   0xb   :  { %169 = vperm.xlu2 %216, %v166_v17  }
   0xd   :  { %127 = vperm.xlu0 %214, %v123_v11  }
   0xe   :  { %182 = vmatpush.xpose.msk.msra.mxu0 %vm40_vm0, %v34_v3  ;;  %200 = vmatpush.xpose.msk.msra.mxu1 %vm40_vm0, %v34_v3 }
   0xf   :  { %154 = vperm.xlu1 %215, %v146_v16  }
  0x12   :  { %183 = vmatpush.xpose.msk.msra.mxu0 %vm40_vm0, %v33_v4  ;;  %201 = vmatpush.xpose.msk.msra.mxu1 %vm40_vm0, %v33_v4 }
  0x16   :  { %184 = vmatpush.xpose.msk.msra.mxu0 %vm40_vm0, %v32_v5  ;;  %202 = vmatpush.xpose.msk.msra.mxu1 %vm40_vm0, %v32_v5 }
  0x1a   :  { %185 = vmatpush.xpose.msk.msra.mxu0 %vm40_vm0, %v31_v6  ;;  %203 = vmatpush.xpose.msk.msra.mxu1 %vm40_vm0, %v31_v6 }
  0x1e   :  { %186 = vmatpush.xpose.msk.msra.mxu0 %vm40_vm0, %v30_v8  ;;  %204 = vmatpush.xpose.msk.msra.mxu1 %vm40_vm0, %v30_v8 }
  0x22   :  { %187 = vmatpush.xpose.msk.msra.mxu0 %vm40_vm0, %v29_v10  ;;  %205 = vmatpush.xpose.msk.msra.mxu1 %vm40_vm0, %v29_v10 }
  0x26   :  { %188 = vmatpush.xpose.msk.msra.mxu0 %vm40_vm0, %v28_v14  ;;  %206 = vmatpush.xpose.msk.msra.mxu1 %vm40_vm0, %v28_v14 }
  0x2a   :  { %189 = vmatpush.xpose.msk.msra.mxu0 %vm40_vm0, %v27_v15  ;;  %207 = vmatpush.xpose.msk.msra.mxu1 %vm40_vm0, %v27_v15 }
  0x2e   :  { %190 = vmatpush.xpose.msk.msra.mxu0 %vm40_vm0, %v26_v18  ;;  %208 = vmatpush.xpose.msk.msra.mxu1 %vm40_vm0, %v26_v18 }
  0x32   :  { %191 = vmatpush.xpose.msk.msra.mxu0 %vm40_vm0, %v25_v19  ;;  %209 = vmatpush.xpose.msk.msra.mxu1 %vm40_vm0, %v25_v19 }
  0x36   :  { %192 = vmatpush.xpose.msk.msra.mxu0 %vm40_vm0, %v24_v20  ;;  %210 = vmatpush.xpose.msk.msra.mxu1 %vm40_vm0, %v24_v20 }
  0x3a   :  { %193 = vmatpush.xpose.msk.msra.mxu0 %vm40_vm0, %v23_v21  ;;  %211 = vmatpush.xpose.msk.msra.mxu1 %vm40_vm0, %v23_v21 }
  0x3e   :  { %194 = vmatpush.xpose.msk.msra.mxu0 %vm40_vm0, %v22_v22  ;;  %212 = vmatpush.xpose.msk.msra.mxu1 %vm40_vm0, %v22_v22 }
  0x41   :  { %195 = vmatmul.msk.f32.vlgmr.msra.gmra.mxu0 %vm40_vm0, %v38_v23  ;;  %196 = vmatmul.msk.f32.vlgmr.msra.gmra.mxu1 %vm40_vm0, %v39_v24 }
  0x65   :  { %v170_v45 = vpop.permute.xlu2 %169 }
  0x66   :  { %v172_v48 = vperm.slane %v170_v45, 0 }
  0x77   :  { %v133_v25 = vpop.permute.xlu0 %132 }
  0x79   :  { %v150_v31 = vpop.permute.xlu1 %149 }
  0x7f   :  { %v128_v27 = vpop.permute.xlu0 %127 }
  0x81   :  { %v155_v38 = vpop.permute.xlu1 %154 }
  0xbe   :  { %v112_v28 = vpop.f32.mrf.mxu0  ;;  %v115_v29 = vpop.f32.mrf.mxu1 }
  0xbf   :  { %v135_v32 = vadd.f32 %v128_v27, %v112_v28  ;;  %v136_v33 = vadd.f32 %v133_v25, %v115_v29 }
  0xc1   :  { %217 = vtanh.f32 %v135_v32 }
  0xc2   :  { %219 = vtanh.f32 %v136_v33 }
  0xc7   :  { %v218_v35 = vpop.eup %217 }
  0xc8   :  { %v220_v36 = vpop.eup %219  ;;  %v157_v37 = vmul.f32 %v218_v35, %v150_v31 }
  0xc9   :  { %v144_v39 = vsel %vm122_vm1, %v220_v36, %v115_v29 }
  0xca   :  { %v158_v40 = vmul.f32 %v155_v38, %v144_v39 }
  0xcc   :  { %v159_v41 = vadd.f32 %v158_v40, %v157_v37 }
  0xce   :  { %v160_v42 = vrot.slane %v159_v41, 4 }
  0xd0   :  { %v161_v43 = vadd.f32 %v160_v42, %v159_v41 }
  0xd2   :  { %v162_v44 = vrot.slane %v161_v43, 2 }
  0xd4   :  { %v163_v46 = vadd.f32 %v162_v44, %v161_v43 }
  0xd6   :  { %v164_v47 = vrot.slane %v163_v46, 1 }
  0xd8   :  { %v165_v49 = vadd.f32 %v164_v47, %v163_v46 }
  0xda   :  { %v173_v50 = vadd.f32 %v172_v48, %v165_v49 }
  0xdc   :  { %174 = vst [vmem:[%s363_s5] sm:$0x1] %v173_v50 }

</bundles_post_ra>
